<compile_context>
chip_gen: v7x
topology: tpu7x:2x2x1
jax: 0.10.0
libtpu: 0.0.40
codegen_flags: <defaults>
</compile_context>

<pallas_src>
import math

import numpy as np
import jax
import jax.numpy as jnp
from jax.experimental import pallas as pl
from jax.experimental.pallas import tpu as pltpu


# ---- Pallas kernel: pooled tokens for one batch element ---------------------
def _pool_kernel(p_ref, x_ref, o_ref):
    # p_ref: (No, N) pooling matrix, x_ref: (1, N, C), o_ref: (1, No, C)
    o_ref[0] = jnp.dot(p_ref[...], x_ref[0],
                       preferred_element_type=jnp.float32).astype(o_ref.dtype)


# ---- host-side pooling matrix (exact AdaptiveAvgPool2d window semantics) ----
def _adaptive_pool_matrix(h, w, ho, wo):
    p = np.zeros((ho * wo, h * w), dtype=np.float32)
    for i in range(ho):
        hs, he = (i * h) // ho, math.ceil((i + 1) * h / ho)
        for j in range(wo):
            ws, we = (j * w) // wo, math.ceil((j + 1) * w / wo)
            weight = 1.0 / float((he - hs) * (we - ws))
            for r in range(hs, he):
                for c in range(ws, we):
                    p[i * wo + j, r * w + c] = weight
    return jnp.asarray(p)


def token_down(x, out_hw):
    """TokenDownLayer forward.  x: (B, N, C) with N a perfect square."""
    B, N, C = x.shape
    H = int(math.isqrt(N))
    assert H * H == N, "num_tokens must be a perfect square"
    Ho, Wo = out_hw
    No = Ho * Wo
    P = _adaptive_pool_matrix(H, H, Ho, Wo)          # (No, N), static

    return pl.pallas_call(
        _pool_kernel,
        out_shape=jax.ShapeDtypeStruct((B, No, C), x.dtype),
        grid=(B,),
        in_specs=[
            pl.BlockSpec((No, N), lambda b: (0, 0)),       # pooling matrix
            pl.BlockSpec((1, N, C), lambda b: (b, 0, 0)),  # tokens of batch b
        ],
        out_specs=pl.BlockSpec((1, No, C), lambda b: (b, 0, 0)),
        compiler_params=pltpu.CompilerParams(
            dimension_semantics=("parallel",)),
    )(P, x)


# ---- pure-JAX reference (mirrors the PyTorch module, for verification) ------
def token_down_reference(x, out_hw):
    B, N, C = x.shape
    H = int(math.isqrt(N))
    Ho, Wo = out_hw
    xi = jnp.transpose(x, (0, 2, 1)).reshape(B, C, H, H)   # (B, C, H, H)
    rows = []
    for i in range(Ho):
        hs, he = (i * H) // Ho, math.ceil((i + 1) * H / Ho)
        cols = []
        for j in range(Wo):
            ws, we = (j * H) // Wo, math.ceil((j + 1) * H / Wo)
            cols.append(jnp.mean(xi[:, :, hs:he, ws:we], axis=(2, 3)))
        rows.append(jnp.stack(cols, axis=-1))               # (B, C, Wo)
    pooled = jnp.stack(rows, axis=-2)                        # (B, C, Ho, Wo)
    return jnp.transpose(pooled.reshape(B, C, Ho * Wo), (0, 2, 1))


if __name__ == "__main__":
    key = jax.random.PRNGKey(0)
    k1, k2 = jax.random.split(key)

    # main check: 64 tokens (8x8 grid), 128 channels (lane-dense), pool to 4x4
    x = jax.random.normal(k1, (2, 64, 128), jnp.float32)
    out = jax.block_until_ready(token_down(x, (4, 4)))
    ref = token_down_reference(x, (4, 4))
    err = float(jnp.max(jnp.abs(out - ref)))
    if not (err < 1e-4):
        raise AssertionError(f"kernel/reference mismatch: max abs err = {err}")

    # adaptive (non-divisible windows) check: 49 tokens (7x7) -> 3x3, C=32
    x2 = jax.random.normal(k2, (2, 49, 32), jnp.float32)
    out2 = jax.block_until_ready(token_down(x2, (3, 3)))
    ref2 = token_down_reference(x2, (3, 3))
    err2 = float(jnp.max(jnp.abs(out2 - ref2)))
    if not (err2 < 1e-4):
        raise AssertionError(f"kernel/reference mismatch (adaptive): {err2}")

    print("KERNEL_OK")
</pallas_src>

<mosaic_0001>
module attributes {stable_mosaic.version = 11 : i64} {
  func.func @_pool_kernel(%arg0: i32, %arg1: memref<16x64xf32, #tpu.memory_space<vmem>>, %arg2: memref<1x64x128xf32, #tpu.memory_space<vmem>>, %arg3: memref<1x16x128xf32, #tpu.memory_space<vmem>>) attributes {dimension_semantics = [#tpu.dimension_semantics<parallel>], iteration_bounds = array<i64: 2>, scalar_prefetch = 0 : i64, scratch_operands = 0 : i64, tpu.core_type = #tpu.core_type<tc>, window_params = [{pipeline_mode = #tpu.pipeline_mode<synchronous>, transform_indices = @transform_0, window_bounds = array<i64: 16, 64>}, {transform_indices = @transform_1, window_bounds = array<i64: 1, 64, 128>}, {transform_indices = @transform_2, window_bounds = array<i64: 1, 16, 128>}]} {
    %c0 = arith.constant 0 : index
    %c0_0 = arith.constant 0 : index
    %0 = vector.load %arg1[%c0, %c0_0] : memref<16x64xf32, #tpu.memory_space<vmem>>, vector<16x64xf32>
    %c0_1 = arith.constant 0 : index
    %c0_2 = arith.constant 0 : index
    %c0_3 = arith.constant 0 : index
    %1 = vector.load %arg2[%c0_1, %c0_2, %c0_3] : memref<1x64x128xf32, #tpu.memory_space<vmem>>, vector<1x64x128xf32>
    %2 = vector.shape_cast %1 : vector<1x64x128xf32> to vector<64x128xf32>
    %cst = arith.constant dense<0.000000e+00> : vector<16x128xf32>
    %3 = tpu.matmul %0, %2, %cst {dimension_numbers = #tpu.dot_dimension_numbers<[1], [0], [0], [1], [0, 0, 1, 1], [], []>} : vector<16x64xf32>, vector<64x128xf32>, vector<16x128xf32> -> vector<16x128xf32>
    %c0_4 = arith.constant 0 : index
    %c0_5 = arith.constant 0 : index
    %c0_6 = arith.constant 0 : index
    %4 = vector.load %arg3[%c0_4, %c0_5, %c0_6] : memref<1x16x128xf32, #tpu.memory_space<vmem>>, vector<1x16x128xf32>
    %5 = vector.shape_cast %4 : vector<1x16x128xf32> to vector<16x128xf32>
    %6 = vector.shape_cast %3 : vector<16x128xf32> to vector<1x16x128xf32>
    tpu.vector_store %arg3[%c0_4, %c0_5, %c0_6], %6 {strides = array<i32>} : memref<1x16x128xf32, #tpu.memory_space<vmem>>, vector<1x16x128xf32>,
    return
  }
  func.func @transform_0(%arg0: i32) -> (i32, i32) {
    %c0_i32 = arith.constant 0 : i32
    %c0_i32_0 = arith.constant 0 : i32
    %c0_i32_1 = arith.constant 0 : i32
    return %c0_i32, %c0_i32_0 : i32, i32
  }
  func.func @transform_1(%arg0: i32) -> (i32, i32, i32) {
    %c0_i32 = arith.constant 0 : i32
    %c0_i32_0 = arith.constant 0 : i32
    %c0_i32_1 = arith.constant 0 : i32
    return %arg0, %c0_i32, %c0_i32_0 : i32, i32, i32
  }
  func.func @transform_2(%arg0: i32) -> (i32, i32, i32) {
    %c0_i32 = arith.constant 0 : i32
    %c0_i32_0 = arith.constant 0 : i32
    %c0_i32_1 = arith.constant 0 : i32
    return %arg0, %c0_i32, %c0_i32_0 : i32, i32, i32
  }
}

</mosaic_0001>

<bundles_post_ra>
// kernel: tpu_custom_call.1
= control target key start
LH: loop header
LB: loop body
LE: loop exit
PB: predicated region body
PF: predicated region fallthrough
CT: control target
= control target key end

     0   :  { %7 = vsyncpa [#allocation3], 0  ;;  %s858_s0 = inlined_call_operand.hbm [shape: f32[16,64], index: 0, kind: input, shape index: {}]   ;;  %s859_s1 = inlined_call_operand.hbm [shape: f32[2,64,128], index: 1, kind: input, shape index: {}]   ;;  %s860_s2 = inlined_call_operand.hbm [shape: f32[2,16,128], index: 2, kind: output, shape index: {}]  }
   0x1   :  { %8 = vsyncpa [#allocation6], 0 }
   0x2   :  { %10 = vsyncpa [#allocation6 + $0x1], 0 }
   0x3   :  { %11 = vsyncpa [#allocation4], 0 }
   0x4   :  { %13 = vsyncpa [#allocation4 + $0x1], 0  ;;  %s648_s9 = smov 0   ;;  %s650_s10 = smov 0  }
   0x5   :  { %s652_s11 = smov 0   ;;  %s654_s12 = smov 0  }
   0x6 LB: > { %s669_s13 = sadd.s32 4294967295, %s624_s12   ;;  %s370_s14 = sadd.s32 4294967294, %s624_s12   ;;  %s624_s12 = sphi %s654_s12, %s880_s12   ;;  %s620_s11 = sphi %s652_s11, %s879_s11   ;;  %s616_s10 = sphi %s650_s10, %s878_s10   ;;  %s612_s9 = sphi %s648_s9, %s877_s9  }
   0x7   : > { %p60_p0 = scmp.ne.s32.totalorder %s616_s10, %s612_s9  ;;  %p861_p1 = scmp.eq.s32.totalorder %s669_s13, 0 }
   0x8   : > { %p90_p3 = scmp.eq.s32.totalorder %s370_s14, 1  ;;  %p371_p5 = scmp.ge.s32.totalorder %s624_s12, 1 }
   0x9   : > { %p678_p4 = por %p861_p1, %p60_p0  ;;  %p97_p7 = scmp.lt.s32.totalorder %s624_s12, 3 }
   0xa   : > { %p683_p6 = por %p90_p3, %p60_p0  ;;  %s626_s18 = smov [#allocation2]  }
   0xb   : > { %s864_s15 = scalar_select %p678_p4, 1, 0 }
   0xc   : > { %s865_s16 = scalar_select %p683_p6, 1, 0 }
   0xd   : > { %p688_p8 = pnand %p371_p5, %p97_p7  ;;  %s109_s19 = sshll.u32 %s626_s18, 4  ;;  %s692_s19 = int_to_ptr.vmem [resolvable:$true] %s109_s19 }
   0xe   : > { %s704_s21 = sadd.s32 1, %s624_s12   ;;  %s47_s22 = sadd.s32 1, %s620_s11 }
   0xf   : > { %s866_s17 = scalar_select %p688_p8, 1, 0 }
  0x10   : > { %p443_p9 = pneg %p688_p8  ;;  %s44_s23 = ssub.s32 %s624_s12, %s704_s21 }
  0x11   : > { %s496_s26 = scalar_lea.hbm %s858_s0, 256 }
  0x12   : > { %p699_p11 = pnand %p443_p9, %p861_p1  ;;  %p497_p12 = scmp.ne.s32.totalorder %s858_s0, %s496_s26 }
  0x13   : > { %p503_p5 = scmp.lt.u32.totalorder %s496_s26, %s858_s0 }
  0x14   : > { %p498_p13 = pneg %p699_p11 }
  0x16   : > { %p499_p0 = pnand %p498_p13, %p497_p12 }
  0x18   : > { %p500_p3 = pneg %p499_p0 }
  0x1a   : > { %p505_p7 = pnand %p503_p5, %p500_p3 }
  0x1c   : > { %508 = shalt.err (!%p505_p7)
}
  0x1d   : > { %s509_s3 = scalar_lea.vmem %s692_s19, 256  ;;  %p517_p2 = scmp.lt.s32.totalorder %s692_s19, %s692_s19 }
  0x1e   : > { %p510_p9 = scmp.ne.s32.totalorder %s692_s19, %s509_s3  ;;  %p518_p6 = scmp.lt.s32.totalorder %s509_s3, %s509_s3 }
  0x20   : > { %p512_p10 = pnand %p510_p9, %p498_p13  ;;  %p519_p4 = por %p518_p6, %p517_p2 }
  0x22   : > { %p513_p1 = pneg %p512_p10 }
  0x24   : > { %p520_p8 = pnand %p519_p4, %p513_p1 }
  0x26   : > { %523 = shalt.err (!%p520_p8)
}
  0x27   : > { %s627_s4 = smov 128   ;;  %s628_s5 = smov 8  }
  0x28   : > { %446 = dma.hbm_to_vmem [thread:$0]  (!%p699_p11), %s858_s0, 256, %s692_s19, [#allocation3], %s627_s4, %s627_s4, %s628_s5  }
  0x29   : > { %p45_p1 = scmp.eq.s32.totalorder %s44_s23, 0  ;;  %p54_p2 = scmp.ne.s32.totalorder %s620_s11, %s616_s10 }
  0x2a   : > { %p55_p4 = scmp.eq.s32.totalorder %s624_s12, 0  ;;  %p456_p6 = scmp.lt.s32.totalorder %s624_s12, 2 }
  0x2b   : > { %s738_s8 = scalar_select %p45_p1, %s620_s11, %s47_s22  }
  0x2c   : > { %p56_p8 = por %p55_p4, %p54_p2  ;;  %p868_p10 = scmp.eq.s32.totalorder %s669_s13, 1 }
  0x2d   : > { %s123_s18 = sand.u32 1, %s620_s11   ;;  %s388_s20 = sshll.u32 %s624_s12, 10 }
  0x2e   : > { %p742_p12 = por %p868_p10, %p54_p2  ;;  %s374_s24 = sshll.u32 %s123_s18, 6 }
  0x2f   : > { %s751_s27 = scalar_lea.hbm %s859_s1, %s388_s20  ;;  %s127_s19 = scalar_lea.vmem [#allocation5], %s374_s24 }
  0x30   : > { %s134_s22 = sshll.u32 %s127_s19, 4  ;;  %p753_p11 = pnand %p456_p6, %p56_p8  ;;  %s757_s22 = int_to_ptr.vmem [resolvable:$true] %s134_s22 }
  0x31   : > { %s759_s28 = scalar_lea.sflag [#allocation6], %s123_s18  ;;  %s524_s29 = scalar_lea.hbm %s751_s27, 1024 }
  0x32   : > { %p525_p13 = scmp.ne.s32.totalorder %s751_s27, %s524_s29  ;;  %p526_p0 = pneg %p753_p11 }
  0x33   : > { %s529_s6 = scalar_lea.hbm %s859_s1, 2048  ;;  %p530_p7 = scmp.lt.u32.totalorder %s751_s27, %s859_s1 }
  0x34   : > { %p527_p3 = pnand %p526_p0, %p525_p13  ;;  %p531_p9 = scmp.lt.u32.totalorder %s529_s6, %s524_s29 }
  0x35   : > { %p533_p2 = scmp.lt.u32.totalorder %s524_s29, %s751_s27 }
  0x36   : > { %p528_p5 = pneg %p527_p3  ;;  %p532_p1 = por %p531_p9, %p530_p7 }
  0x38   : > { %p534_p4 = por %p533_p2, %p532_p1 }
  0x3a   : > { %p535_p6 = pnand %p534_p4, %p528_p5 }
  0x3c   : > { %538 = shalt.err (!%p535_p6)
}
  0x3d   : > { %s539_s18 = scalar_lea.vmem %s757_s22, 1024  ;;  %s629_s24 = smov [#allocation5]  }
  0x3e   : > { %p540_p8 = scmp.ne.s32.totalorder %s757_s22, %s539_s18  ;;  %s544_s25 = sshll.u32 %s629_s24, 4  ;;  %s545_s25 = int_to_ptr.vmem [resolvable:$false] %s544_s25 }
  0x3f   : > { %s546_s26 = scalar_lea.vmem %s545_s25, 2048  ;;  %p547_p3 = scmp.lt.s32.totalorder %s757_s22, %s545_s25 }
  0x40   : > { %p542_p10 = pnand %p540_p8, %p526_p0  ;;  %p548_p7 = scmp.lt.s32.totalorder %s546_s26, %s539_s18 }
  0x42   : > { %p543_p13 = pneg %p542_p10  ;;  %p549_p9 = por %p548_p7, %p547_p3 }
  0x44   : > { %p550_p1 = pnand %p549_p9, %p543_p13 }
  0x46   : > { %553 = shalt.err (!%p550_p1)
}
  0x47   : > { %450 = dma.hbm_to_vmem [thread:$0]  (!%p753_p11), %s751_s27, 1024, %s757_s22, %s759_s28, %s627_s4, %s627_s4, %s628_s5  }
  0x48   : > { %p871_p0 = scmp.ne.s32.totalorder %s866_s17, 0 }
  0x49   : > { %p872_p5 = scmp.eq.s32.totalorder (!%p871_p0), %s669_s13, 0 }
  0x4a   : > { %146 = sbr.rel (%p871_p0) target bundleno = 333 (0x14d), region = 28 }
  0x51   : > { %599 = dma.done.wait (%p872_p5), [#allocation3], 256   ;;  %p873_p2 = pmov %p872_p5 }
  0x52   : > { %s797_s19 = sand.u32 1, %s616_s10   ;;  %p874_p4 = scmp.ne.s32.totalorder %s864_s15, 0 }
  0x53   : > { %601 = vsyncadd (%p873_p2), [#allocation3], 4294967040  ;;  %s379_s23 = sshll.u32 %s797_s19, 6  ;;  %s153_s29 = scalar_lea.sflag [#allocation6], %s797_s19 }
  0x54   : > { %s156_s30 = scalar_lea.vmem [#allocation5], %s379_s23 }
  0x55   : > { %603 = dma.done.wait (%p874_p4), %s153_s29, 1024  }
  0x56   : > { %605 = vsyncadd (%p874_p4), %s153_s29, 4294966272  ;;  %v179_v0 = vld [vmem:[%s156_s30] sm:$0xff]  ;;  %v180_v1 = vld [vmem:[%s156_s30 + $0x8] sm:$0xff]  ;;  %vm187_vm0 = vcmask 523264   ;;  %s380_s15 = sshll.u32 %s797_s19, 4  ;;  %s389_s5 = sshll.u32 %s669_s13, 8 }
  0x57   : > { %v181_v2 = vld [vmem:[%s156_s30 + $0x10] sm:$0xff]  ;;  %v419_v3 = vpack.c.bf16 %v180_v1, %v179_v0  ;;  %v182_v4 = vld [vmem:[%s156_s30 + $0x18] sm:$0xff]  ;;  %v183_v6 = vld [vmem:[%s156_s30 + $0x20] sm:$0xff]  ;;  %s176_s17 = scalar_lea.vmem [#allocation7], %s380_s15  ;;  %s814_s28 = scalar_lea.hbm %s860_s2, %s389_s5 }
  0x58   : > { %v423_v5 = vpack.c.bf16 %v182_v4, %v181_v2  ;;  %v184_v7 = vld [vmem:[%s156_s30 + $0x28] sm:$0xff]  ;;  %v177_v8 = vld [vmem:[#allocation2] sm:$0xff]  ;;  %v186_v11 = vld [vmem:[%s156_s30 + $0x38] sm:$0xff]  ;;  %s285_s4 = sshll.u32 %s176_s17, 4  ;;  %s272_s3 = scalar_lea.sflag [#allocation4], %s797_s19  ;;  %s809_s4 = int_to_ptr.vmem [resolvable:$true] %s285_s4 }
  0x59   : > { %420 = vmatprep.subr.bf16.mxu0 %v419_v3  ;;  %416 = vmatprep.mubr.msk.f32.mxu0 %vm187_vm0, %v177_v8  ;;  %v427_v9 = vpack.c.bf16 %v184_v7, %v183_v6  ;;  %v185_v10 = vld [vmem:[%s156_s30 + $0x30] sm:$0xff]  ;;  %v178_v13 = vld [vmem:[#allocation2 + $0x8] sm:$0xff]  ;;  %s554_s6 = scalar_lea.vmem %s809_s4, 256  ;;  %s630_s13 = smov [#allocation7]  }
  0x5a   : > { %422 = vmatpush3.bf16.msra.mxu0 %v419_v3  ;;  %v431_v12 = vpack.c.bf16 %v186_v11, %v185_v10  ;;  %p555_p11 = scmp.ne.s32.totalorder %s809_s4, %s554_s6  ;;  %s558_s7 = sshll.u32 %s630_s13, 4  ;;  %s559_s7 = int_to_ptr.vmem [resolvable:$false] %s558_s7 }
  0x5b   : > { %424 = vmatprep.subr.bf16.mxu0 %v423_v5  ;;  %s560_s20 = scalar_lea.vmem %s559_s7, 512  ;;  %p561_p10 = scmp.lt.s32.totalorder %s809_s4, %s559_s7 }
  0x5c   : > { %p556_p6 = pnand %p555_p11, %p742_p12  ;;  %p562_p13 = scmp.lt.s32.totalorder %s560_s20, %s554_s6 }
  0x5e   : > { %426 = vmatpush3.bf16.msra.mxu0 %v423_v5  ;;  %p557_p8 = pneg %p556_p6  ;;  %p563_p3 = por %p562_p13, %p561_p10 }
  0x5f   : > { %428 = vmatprep.subr.bf16.mxu0 %v427_v9 }
  0x60   : > { %p564_p7 = pnand %p563_p3, %p557_p8 }
  0x62   : > { %430 = vmatpush3.bf16.msra.mxu0 %v427_v9 }
  0x63   : > { %432 = vmatprep.subr.bf16.mxu0 %v431_v12 }
  0x66   : > { %434 = vmatpush3.bf16.msra.mxu0 %v431_v12 }
  0x69   : > { %417 = vmatmul.mubr.msk.f32.vlgmr.msra.gmra.mrb[0].mxu0 %vm187_vm0, %v178_v13 }
 0x13c   : > { %v418_v14 = vpop.f32.mrb[0].mxu0 }
 0x13d   : > { %270 = vst [vmem:[%s176_s17 + $0x8] sm:$0xff] %v418_v14  ;;  %v260_v15 = vpop.f32.mrb[1].mxu0 }
 0x13e   : > { %269 = vst [vmem:[%s176_s17] sm:$0xff] %v260_v15 }
 0x13f   : > { %567 = shalt.err (!%p564_p7)
}
 0x140   : > { %s568_s18 = scalar_lea.hbm %s814_s28, 256  ;;  %s572_s26 = scalar_lea.hbm %s860_s2, 512 }
 0x141   : > { %p569_p9 = scmp.ne.s32.totalorder %s814_s28, %s568_s18  ;;  %p573_p5 = scmp.lt.u32.totalorder %s814_s28, %s860_s2 }
 0x142   : > { %p574_p2 = scmp.lt.u32.totalorder %s572_s26, %s568_s18  ;;  %p576_p11 = scmp.lt.u32.totalorder %s568_s18, %s814_s28 }
 0x143   : > { %p570_p1 = pnand %p569_p9, %p742_p12 }
 0x144   : > { %p575_p4 = por %p574_p2, %p573_p5 }
 0x145   : > { %p571_p0 = pneg %p570_p1 }
 0x146   : > { %p577_p6 = por %p576_p11, %p575_p4 }
 0x148   : > { %p578_p8 = pnand %p577_p6, %p571_p0 }
 0x14a   : > { %581 = shalt.err (!%p578_p8)
}
 0x14b   : > { %s631_s30 = smov 128   ;;  %s632_s15 = smov 8  }
 0x14c   : > { %441 = dma.vmem_to_hbm [thread:$0]  (%p742_p12), %s809_s4, 256, %s814_s28, %s272_s3, %s631_s30, %s631_s30, %s632_s15  }
 0x14d PF: > { %s300_s17 = sand.u32 1, %s612_s9   ;;  %p875_p10 = scmp.ne.s32.totalorder %s865_s16, 0 }
 0x14e   : > { %p876_p13 = scmp.ge.s32.totalorder %s624_s12, 2  ;;  %s301_s5 = scalar_lea.sflag [#allocation4], %s300_s17 }
 0x150   : > { %p452_p3 = pnand %p876_p13, %p875_p10 }
 0x152   : > { %607 = dma.done.wait (!%p452_p3), %s301_s5, 256  }
 0x153   : > { %609 = vsyncadd (!%p452_p3), %s301_s5, 4294967040  ;;  %p16_p7 = scmp.ge.s32.totalorder %s704_s21, 4   ;;  %s877_s9 = smov %s616_s10 }
 0x154   : > { %s878_s10 = smov %s620_s11  ;;  %s879_s11 = smov %s738_s8 }
 0x155   : > { %s880_s12 = smov %s704_s21  ;;  %18 = sbr.rel (!%p16_p7) target bundleno = 6 (0x6), region = 78 }
 0x15c   :  { %306 = vsyncpa [#allocation3], 1 }
 0x15d   :  { %308 = vsyncpa [#allocation3 + $0x1], 1 }
 0x15e   :  { %309 = vsyncpa [#allocation6], 1 }
 0x15f   :  { %311 = vsyncpa [#allocation6 + $0x1], 1 }
 0x160   :  { %312 = vsyncpa [#allocation4], 1 }
 0x161   :  { %314 = vsyncpa [#allocation4 + $0x1], 1 }

</bundles_post_ra>
